<compile_context>
chip_gen: v6e
topology: v6e:2x2x1
jax: 0.10.0
libtpu: 0.0.40
codegen_flags: <defaults>
</compile_context>

<pallas_src>
import jax
import jax.numpy as jnp
from jax.experimental import pallas as pl
from jax.experimental.pallas import tpu as pltpu  # noqa: F401  (kept for TODO paths)


def _round_up(x, m):
    return ((x + m - 1) // m) * m


def _pad2(x, rows, cols, dtype):
    """Zero-pad a 2-D array to (rows, cols) and cast."""
    out = jnp.zeros((rows, cols), dtype)
    return out.at[: x.shape[0], : x.shape[1]].set(x.astype(dtype))


# ----------------------------- fused forward kernel -----------------------------
def _make_fused_graphsage_kernel(n_layers):
    """Refs: feat, A_0..A_{L-1}, W_all[L,2D,D], B_all[L,1,D], fc_w[D,C], fc_b[1,C], out."""

    def kernel(*refs):
        feat_ref = refs[0]
        a_refs = refs[1:1 + n_layers]
        w_all_ref = refs[1 + n_layers]
        b_all_ref = refs[2 + n_layers]
        fcw_ref = refs[3 + n_layers]
        fcb_ref = refs[4 + n_layers]
        out_ref = refs[5 + n_layers]

        cdt = feat_ref.dtype                 # MXU operand dtype (bf16 default, f32 check path)
        h = feat_ref[...]                    # [n_src_0, D]

        for l in range(n_layers):
            a = a_refs[l][...]               # [n_dst, n_src], row-normalized (mean agg)
            n_dst = a.shape[0]
            h_dst = h[:n_dst]                # DGL block convention: dst rows come first

            # mean aggregation, f32 accumulation
            agg = jnp.dot(a, h, preferred_element_type=jnp.float32)          # [n_dst, D]

            # fused neigh/self GEMM: [agg || h_dst] @ [W_neigh ; W_self]
            x = jnp.concatenate([agg.astype(cdt), h_dst], axis=1)            # [n_dst, 2D]
            out = (jnp.dot(x, w_all_ref[l], preferred_element_type=jnp.float32)
                   + b_all_ref[l])                                           # [n_dst, D] f32

            h = jnp.maximum(out, 0.0).astype(cdt)   # ReLU after every conv (as in reference)

        logits = (jnp.dot(h, fcw_ref[...], preferred_element_type=jnp.float32)
                  + fcb_ref[...])                                            # [n_out, C] f32
        out_ref[...] = logits

    return kernel


# -------------------------------- model wrapper ----------------------------------
def graphsage_forward(blocks, feat, params, *, compute_dtype=jnp.bfloat16):
    """blocks: list of row-normalized adjacencies [N_dst_l, N_src_l];
       feat: [N_src_0, in_feats].  Returns logits [N_dst_last, n_classes] (f32)."""
    n_layers = len(blocks)
    layers = params["layers"]
    assert len(layers) == n_layers
    n_out = blocks[-1].shape[0]
    n_classes = params["fc_w"].shape[1]
    in_feats = feat.shape[1]
    n_hidden = layers[0]["w_neigh"].shape[1]
    cdt = compute_dtype

    # Lane-dense padded widths (multiples of 128).
    D = _round_up(max(in_feats, n_hidden), 128)
    C = _round_up(n_classes, 128)

    # Inputs (7 streams total for 2 layers).
    feat_p = _pad2(feat, feat.shape[0], D, cdt)
    a_list = [a.astype(cdt) for a in blocks]
    # TODO(synk): if mean-aggregation accuracy matters in bf16, pass the 0/1 adjacency
    # (exact in bf16) and apply the 1/deg row scale in f32 on the accumulator instead.

    w_stacked, b_stacked = [], []
    for p in layers:
        wn = _pad2(p["w_neigh"], D, D, cdt)
        ws = _pad2(p["w_self"], D, D, cdt)
        w_stacked.append(jnp.concatenate([wn, ws], axis=0))                  # [2D, D]
        b_stacked.append(_pad2(p["bias"].reshape(1, -1), 1, D, jnp.float32))  # [1, D]
    w_all = jnp.stack(w_stacked)   # [L, 2D, D] cdt
    b_all = jnp.stack(b_stacked)   # [L, 1, D]  f32

    fcw = _pad2(params["fc_w"], D, C, cdt)
    fcb = _pad2(params["fc_b"].reshape(1, -1), 1, C, jnp.float32)

    inputs = [feat_p, *a_list, w_all, b_all, fcw, fcb]

    # Advisory cost estimate so XLA can schedule/overlap the call.
    flops = 0
    for a in blocks:
        nd, ns = a.shape
        flops += 2 * nd * ns * D            # aggregation matmul
        flops += 2 * nd * (2 * D) * D       # fused neigh/self GEMM
    flops += 2 * n_out * D * C              # final fc
    bytes_accessed = sum(int(x.size) * x.dtype.itemsize for x in inputs) + n_out * C * 4

    out_padded = pl.pallas_call(
        _make_fused_graphsage_kernel(n_layers),
        out_shape=jax.ShapeDtypeStruct((n_out, C), jnp.float32),
        cost_estimate=pl.CostEstimate(flops=int(flops),
                                      transcendentals=0,
                                      bytes_accessed=int(bytes_accessed)),
    )(*inputs)

    return out_padded[:, :n_classes]


# ------------------------------- pure-JAX reference -------------------------------
def graphsage_reference(blocks, feat, params):
    h = feat
    for a_norm, p in zip(blocks, params["layers"]):
        agg = a_norm @ h
        h = jnp.maximum(
            agg @ p["w_neigh"] + h[: a_norm.shape[0]] @ p["w_self"] + p["bias"], 0.0)
    return h @ params["fc_w"] + params["fc_b"]


def make_block(key, n_dst, n_src, p=0.3):
    adj = jax.random.bernoulli(key, p, (n_dst, n_src)).astype(jnp.float32)
    adj = adj.at[jnp.arange(n_dst), jnp.arange(n_dst)].set(1.0)  # ensure degree >= 1
    deg = jnp.sum(adj, axis=1, keepdims=True)
    return adj / deg  # row-normalized (mean aggregator)


if __name__ == "__main__":
    in_feats, n_hidden, n_classes, n_layers = 32, 64, 16, 2
    n_src0, n_dst0, n_dst1 = 64, 32, 16  # block0: 64->32, block1: 32->16

    key = jax.random.PRNGKey(0)
    keys = jax.random.split(key, 12)

    feat = jax.random.normal(keys[0], (n_src0, in_feats), dtype=jnp.float32)
    blocks = [make_block(keys[1], n_dst0, n_src0),
              make_block(keys[2], n_dst1, n_dst0)]

    def init_linear(k, fi, fo, scale=0.1):
        return scale * jax.random.normal(k, (fi, fo), dtype=jnp.float32)

    params = {
        "layers": [
            {"w_neigh": init_linear(keys[3], in_feats, n_hidden),
             "w_self":  init_linear(keys[4], in_feats, n_hidden),
             "bias":    0.01 * jnp.ones((n_hidden,), jnp.float32)},
            {"w_neigh": init_linear(keys[5], n_hidden, n_hidden),
             "w_self":  init_linear(keys[6], n_hidden, n_hidden),
             "bias":    0.01 * jnp.ones((n_hidden,), jnp.float32)},
        ],
        "fc_w": init_linear(keys[7], n_hidden, n_classes),
        "fc_b": 0.01 * jnp.ones((n_classes,), jnp.float32),
    }

    ref = graphsage_reference(blocks, feat, params)

    # Default path: bf16 operands, f32 accumulation (looser tolerance vs f32 ref).
    out = graphsage_forward(blocks, feat, params)
    out = jax.block_until_ready(out)
    assert out.shape == (n_dst1, n_classes)
    assert jnp.allclose(out, ref, atol=5e-2, rtol=5e-2), "bf16 path mismatch vs reference"

    # f32 correctness-check path: bit-tight vs reference (padding is exact zeros).
    out_f32 = graphsage_forward(blocks, feat, params, compute_dtype=jnp.float32)
    out_f32 = jax.block_until_ready(out_f32)
    assert jnp.allclose(out_f32, ref, atol=1e-4, rtol=1e-4), "f32 path mismatch vs reference"

    print("KERNEL_OK")
</pallas_src>

<mosaic_0001>
module attributes {stable_mosaic.version = 11 : i64} {
  func.func @kernel(%arg0: memref<64x128xbf16, #tpu.memory_space<vmem>>, %arg1: memref<32x64xbf16, #tpu.memory_space<vmem>>, %arg2: memref<16x32xbf16, #tpu.memory_space<vmem>>, %arg3: memref<2x256x128xbf16, #tpu.memory_space<vmem>>, %arg4: memref<2x1x128xf32, #tpu.memory_space<vmem>>, %arg5: memref<128x128xbf16, #tpu.memory_space<vmem>>, %arg6: memref<1x128xf32, #tpu.memory_space<vmem>>, %arg7: memref<16x128xf32, #tpu.memory_space<vmem>>) attributes {dimension_semantics = [], scalar_prefetch = 0 : i64, scratch_operands = 0 : i64, tpu.core_type = #tpu.core_type<tc>} {
    %c0 = arith.constant 0 : index
    %c0_0 = arith.constant 0 : index
    %0 = vector.load %arg0[%c0, %c0_0] : memref<64x128xbf16, #tpu.memory_space<vmem>>, vector<64x128xbf16>
    %c0_1 = arith.constant 0 : index
    %c0_2 = arith.constant 0 : index
    %1 = vector.load %arg1[%c0_1, %c0_2] : memref<32x64xbf16, #tpu.memory_space<vmem>>, vector<32x64xbf16>
    %2 = vector.extract_strided_slice %0 {offsets = [0, 0], sizes = [32, 128], strides = [1, 1]} : vector<64x128xbf16> to vector<32x128xbf16>
    %cst = arith.constant dense<0.000000e+00> : vector<32x128xf32>
    %3 = tpu.matmul %1, %0, %cst {dimension_numbers = #tpu.dot_dimension_numbers<[1], [0], [0], [1], [0, 0, 1, 1], [], []>} : vector<32x64xbf16>, vector<64x128xbf16>, vector<32x128xf32> -> vector<32x128xf32>
    %4 = arith.truncf %3 : vector<32x128xf32> to vector<32x128xbf16>
    %5 = tpu.concatenate %4, %2 in 1 : vector<32x128xbf16>, vector<32x128xbf16> -> vector<32x256xbf16>
    %c0_3 = arith.constant 0 : index
    %c0_4 = arith.constant 0 : index
    %c0_5 = arith.constant 0 : index
    %6 = vector.load %arg3[%c0_3, %c0_4, %c0_5] : memref<2x256x128xbf16, #tpu.memory_space<vmem>>, vector<1x256x128xbf16>
    %7 = vector.shape_cast %6 : vector<1x256x128xbf16> to vector<256x128xbf16>
    %cst_6 = arith.constant dense<0.000000e+00> : vector<32x128xf32>
    %8 = tpu.matmul %5, %7, %cst_6 {dimension_numbers = #tpu.dot_dimension_numbers<[1], [0], [0], [1], [0, 0, 1, 1], [], []>} : vector<32x256xbf16>, vector<256x128xbf16>, vector<32x128xf32> -> vector<32x128xf32>
    %c0_7 = arith.constant 0 : index
    %c0_8 = arith.constant 0 : index
    %c0_9 = arith.constant 0 : index
    %9 = vector.load %arg4[%c0_7, %c0_8, %c0_9] : memref<2x1x128xf32, #tpu.memory_space<vmem>>, vector<1x1x128xf32>
    %10 = vector.shape_cast %9 : vector<1x1x128xf32> to vector<1x128xf32>
    %11 = vector.broadcast %10 : vector<1x128xf32> to vector<32x128xf32>
    %12 = arith.addf %8, %11 : vector<32x128xf32>
    %cst_10 = arith.constant 0.000000e+00 : f32
    %13 = vector.broadcast %cst_10 : f32 to vector<32x128xf32>
    %14 = arith.maximumf %12, %13 : vector<32x128xf32>
    %15 = arith.truncf %14 : vector<32x128xf32> to vector<32x128xbf16>
    %c0_11 = arith.constant 0 : index
    %c0_12 = arith.constant 0 : index
    %16 = vector.load %arg2[%c0_11, %c0_12] : memref<16x32xbf16, #tpu.memory_space<vmem>>, vector<16x32xbf16>
    %17 = vector.extract_strided_slice %15 {offsets = [0, 0], sizes = [16, 128], strides = [1, 1]} : vector<32x128xbf16> to vector<16x128xbf16>
    %cst_13 = arith.constant dense<0.000000e+00> : vector<16x128xf32>
    %18 = tpu.matmul %16, %15, %cst_13 {dimension_numbers = #tpu.dot_dimension_numbers<[1], [0], [0], [1], [0, 0, 1, 1], [], []>} : vector<16x32xbf16>, vector<32x128xbf16>, vector<16x128xf32> -> vector<16x128xf32>
    %19 = arith.truncf %18 : vector<16x128xf32> to vector<16x128xbf16>
    %20 = tpu.concatenate %19, %17 in 1 : vector<16x128xbf16>, vector<16x128xbf16> -> vector<16x256xbf16>
    %c1 = arith.constant 1 : index
    %c0_14 = arith.constant 0 : index
    %c0_15 = arith.constant 0 : index
    %21 = vector.load %arg3[%c1, %c0_14, %c0_15] : memref<2x256x128xbf16, #tpu.memory_space<vmem>>, vector<1x256x128xbf16>
    %22 = vector.shape_cast %21 : vector<1x256x128xbf16> to vector<256x128xbf16>
    %cst_16 = arith.constant dense<0.000000e+00> : vector<16x128xf32>
    %23 = tpu.matmul %20, %22, %cst_16 {dimension_numbers = #tpu.dot_dimension_numbers<[1], [0], [0], [1], [0, 0, 1, 1], [], []>} : vector<16x256xbf16>, vector<256x128xbf16>, vector<16x128xf32> -> vector<16x128xf32>
    %c1_17 = arith.constant 1 : index
    %c0_18 = arith.constant 0 : index
    %c0_19 = arith.constant 0 : index
    %24 = vector.load %arg4[%c1_17, %c0_18, %c0_19] : memref<2x1x128xf32, #tpu.memory_space<vmem>>, vector<1x1x128xf32>
    %25 = vector.shape_cast %24 : vector<1x1x128xf32> to vector<1x128xf32>
    %26 = vector.broadcast %25 : vector<1x128xf32> to vector<16x128xf32>
    %27 = arith.addf %23, %26 : vector<16x128xf32>
    %cst_20 = arith.constant 0.000000e+00 : f32
    %28 = vector.broadcast %cst_20 : f32 to vector<16x128xf32>
    %29 = arith.maximumf %27, %28 : vector<16x128xf32>
    %30 = arith.truncf %29 : vector<16x128xf32> to vector<16x128xbf16>
    %c0_21 = arith.constant 0 : index
    %c0_22 = arith.constant 0 : index
    %31 = vector.load %arg5[%c0_21, %c0_22] : memref<128x128xbf16, #tpu.memory_space<vmem>>, vector<128x128xbf16>
    %cst_23 = arith.constant dense<0.000000e+00> : vector<16x128xf32>
    %32 = tpu.matmul %30, %31, %cst_23 {dimension_numbers = #tpu.dot_dimension_numbers<[1], [0], [0], [1], [0, 0, 1, 1], [], []>} : vector<16x128xbf16>, vector<128x128xbf16>, vector<16x128xf32> -> vector<16x128xf32>
    %c0_24 = arith.constant 0 : index
    %c0_25 = arith.constant 0 : index
    %33 = vector.load %arg6[%c0_24, %c0_25] : memref<1x128xf32, #tpu.memory_space<vmem>>, vector<1x128xf32>
    %34 = vector.broadcast %33 : vector<1x128xf32> to vector<16x128xf32>
    %35 = arith.addf %32, %34 : vector<16x128xf32>
    %c0_26 = arith.constant 0 : index
    %c0_27 = arith.constant 0 : index
    %36 = vector.load %arg7[%c0_26, %c0_27] : memref<16x128xf32, #tpu.memory_space<vmem>>, vector<16x128xf32>
    tpu.vector_store %arg7[%c0_26, %c0_27], %35 {strides = array<i32>} : memref<16x128xf32, #tpu.memory_space<vmem>>, vector<16x128xf32>,
    return
  }
}

</mosaic_0001>

<bundles_post_ra>
// kernel: tpu_custom_call.1
= control target key start
LH: loop header
LB: loop body
LE: loop exit
PB: predicated region body
PF: predicated region fallthrough
CT: control target
= control target key end

     0   :  { %12 = vsyncpa [#allocation3], 0  ;;  %s1214_s0 = inlined_call_operand.hbm [shape: bf16[64,128], index: 0, kind: input, shape index: {}]   ;;  %s1215_s1 = inlined_call_operand.hbm [shape: bf16[32,64], index: 1, kind: input, shape index: {}]   ;;  %s1216_s2 = inlined_call_operand.hbm [shape: bf16[16,32], index: 2, kind: input, shape index: {}]   ;;  %s1217_s3 = inlined_call_operand.hbm [shape: bf16[2,256,128], index: 3, kind: input, shape index: {}]   ;;  %s1218_s4 = inlined_call_operand.vmem [shape: f32[2,1,128], index: 4, kind: input, shape index: {}]   ;;  %s1219_s5 = inlined_call_operand.hbm [shape: bf16[128,128], index: 5, kind: input, shape index: {}]   ;;  %s1220_s6 = inlined_call_operand.vmem [shape: f32[1,128], index: 6, kind: input, shape index: {}]   ;;  %s1221_s7 = inlined_call_operand.hbm [shape: f32[16,128], index: 7, kind: output, shape index: {}]  }
   0x1   :  { %13 = vsyncpa [#allocation6], 0 }
   0x2   :  { %14 = vsyncpa [#allocation9], 0 }
   0x3   :  { %15 = vsyncpa [#allocation4], 0  ;;  %s1106_s24 = smov [#allocation5]   ;;  %s1107_s26 = smov [#allocation8]  }
   0x4   :  { %s33_s25 = sshll.u32 %s1106_s24, 4  ;;  %s57_s27 = sshll.u32 %s1107_s26, 4  ;;  %s34_s25 = int_to_ptr.vmem [resolvable:$true] %s33_s25  ;;  %s58_s27 = int_to_ptr.vmem [resolvable:$true] %s57_s27 }
   0x5   :  { %s986_s28 = scalar_lea.vmem %s34_s25, 256  ;;  %p991_p1 = scmp.lt.s32.totalorder %s34_s25, %s34_s25 }
   0x6   :  { %p987_p0 = scmp.ne.s32.totalorder %s34_s25, %s986_s28  ;;  %p992_p2 = scmp.lt.s32.totalorder %s986_s28, %s986_s28 }
   0x8   :  { %p993_p3 = por %p992_p2, %p991_p1 }
   0xa   :  { %p994_p4 = pnand %p993_p3, %p987_p0 }
   0xc   :  { %997 = shalt.err (!%p994_p4)
}
   0xd   :  { %s1108_s29 = smov 64   ;;  %s1109_s30 = smov 4  }
   0xe   :  { %39 = dma.hbm_to_vmem [thread:$0]  %s1215_s1, 256, %s34_s25, [#allocation6], %s1108_s29, %s1108_s29, %s1109_s30  }
   0xf   :  { %s1006_s10 = scalar_lea.vmem %s58_s27, 4096  ;;  %p1011_p6 = scmp.lt.s32.totalorder %s58_s27, %s58_s27 }
  0x10   :  { %p1007_p5 = scmp.ne.s32.totalorder %s58_s27, %s1006_s10  ;;  %p1012_p7 = scmp.lt.s32.totalorder %s1006_s10, %s1006_s10 }
  0x12   :  { %p1013_p8 = por %p1012_p7, %p1011_p6 }
  0x14   :  { %p1014_p9 = pnand %p1013_p8, %p1007_p5 }
  0x16   :  { %1017 = shalt.err (!%p1014_p9)
}
  0x17   :  { %63 = dma.hbm_to_vmem [thread:$0]  %s1217_s3, 4096, %s58_s27, [#allocation9], %s1108_s29, %s1108_s29, %s1109_s30  }
  0x18   :  { %s1110_s13 = smov [#allocation2]   ;;  %s1111_s15 = smov [#allocation7]  }
  0x19   :  { %s21_s14 = sshll.u32 %s1110_s13, 4  ;;  %s45_s16 = sshll.u32 %s1111_s15, 4  ;;  %s22_s14 = int_to_ptr.vmem [resolvable:$true] %s21_s14  ;;  %s46_s16 = int_to_ptr.vmem [resolvable:$true] %s45_s16 }
  0x1a   :  { %s1026_s1 = scalar_lea.vmem %s22_s14, 512  ;;  %p1031_p11 = scmp.lt.s32.totalorder %s22_s14, %s22_s14 }
  0x1b   :  { %p1027_p10 = scmp.ne.s32.totalorder %s22_s14, %s1026_s1  ;;  %p1032_p12 = scmp.lt.s32.totalorder %s1026_s1, %s1026_s1 }
  0x1d   :  { %p1033_p13 = por %p1032_p12, %p1031_p11 }
  0x1f   :  { %p1034_p0 = pnand %p1033_p13, %p1027_p10 }
  0x21   :  { %1037 = shalt.err (!%p1034_p0)
}
  0x22   :  { %27 = dma.hbm_to_vmem [thread:$0]  %s1214_s0, 512, %s22_s14, [#allocation3], %s1108_s29, %s1108_s29, %s1109_s30  }
  0x23   :  { %s1046_s3 = scalar_lea.vmem %s46_s16, 128  ;;  %p1051_p2 = scmp.lt.s32.totalorder %s46_s16, %s46_s16 }
  0x24   :  { %p1047_p1 = scmp.ne.s32.totalorder %s46_s16, %s1046_s3  ;;  %p1052_p3 = scmp.lt.s32.totalorder %s1046_s3, %s1046_s3 }
  0x26   :  { %p1053_p4 = por %p1052_p3, %p1051_p2 }
  0x28   :  { %p1054_p5 = pnand %p1053_p4, %p1047_p1 }
  0x2a   :  { %1057 = shalt.err (!%p1054_p5)
}
  0x2b   :  { %51 = dma.hbm_to_vmem [thread:$0]  %s1216_s2, 128, %s46_s16, [#allocation6], %s1108_s29, %s1108_s29, %s1109_s30  }
  0x2c   :  { %s1112_s21 = smov [#allocation10]  }
  0x2d   :  { %s71_s22 = sshll.u32 %s1112_s21, 4  ;;  %s72_s22 = int_to_ptr.vmem [resolvable:$true] %s71_s22 }
  0x2e   :  { %s1066_s23 = scalar_lea.vmem %s72_s22, 1024  ;;  %p1071_p7 = scmp.lt.s32.totalorder %s72_s22, %s72_s22 }
  0x2f   :  { %p1067_p6 = scmp.ne.s32.totalorder %s72_s22, %s1066_s23  ;;  %p1072_p8 = scmp.lt.s32.totalorder %s1066_s23, %s1066_s23 }
  0x31   :  { %p1073_p9 = por %p1072_p8, %p1071_p7 }
  0x33   :  { %p1074_p10 = pnand %p1073_p9, %p1067_p6 }
  0x35   :  { %1077 = shalt.err (!%p1074_p10)
}
  0x36   :  { %77 = dma.hbm_to_vmem [thread:$0]  %s1219_s5, 1024, %s72_s22, [#allocation9], %s1108_s29, %s1108_s29, %s1109_s30  }
  0x37   :  { %1098 = dma.done.wait [#allocation3], 512  }
  0x38   :  { %1099 = vsyncadd [#allocation3], 4294966784 }
  0x39   :  { %1100 = dma.done.wait [#allocation6], 384  }
  0x3a   :  { %1101 = vsyncadd [#allocation6], 4294966912 }
  0x3b   :  { %1102 = dma.done.wait [#allocation9], 5120  }
  0x3c   :  { %1103 = vsyncadd [#allocation9], 4294962176  ;;  %v931_v0 = vld [vmem:[#allocation2 + $0x18] sm:$0xff]   ;;  %v932_v1 = vld [vmem:[#allocation2 + $0x10] sm:$0xff]   ;;  %vm142_vm0 = vcmask 523264   ;;  %v1113_v28 = vmov 0.0  }
  0x3d   :  { %879 = vmatprep.subr.bf16.mxu0 %v931_v0  ;;  %v933_v2 = vld [vmem:[#allocation2 + $0x8] sm:$0xff]   ;;  %v934_v3 = vld [vmem:[#allocation2] sm:$0xff]   ;;  %v937_v5 = vld [vmem:[#allocation8 + $0x78] sm:$0xff]   ;;  %vm1114_vm1 = vmmov 0   ;;  %vm397_vm2 = vcmask 261120   ;;  %s1115_s29 = smov [#allocation11]  }
  0x3e   :  { %880 = vmatpush3.bf16.msra.mxu0 %v931_v0  ;;  %v935_v4 = vld [vmem:[#allocation5] sm:$0xff]   ;;  %367 = vmatprep.mubr.bf16.mxu1 %v934_v3  ;;  %v938_v6 = vld [vmem:[#allocation8 + $0x38] sm:$0xff]   ;;  %v939_v7 = vld [vmem:[#allocation8 + $0x70] sm:$0xff]   ;;  %s743_s30 = sshll.u32 %s1115_s29, 4  ;;  %s744_s30 = int_to_ptr.vmem [resolvable:$true] %s743_s30 }
  0x3f   :  { %881 = vmatprep.subr.bf16.mxu0 %v932_v1  ;;  %887 = vmatprep.mubr.msk.bf16.mxu0 %vm142_vm0, %v935_v4  ;;  %v940_v8 = vld [vmem:[#allocation8 + $0x30] sm:$0xff]   ;;  %v941_v9 = vld [vmem:[#allocation8 + $0x68] sm:$0xff]   ;;  %v943_v12 = vld [vmem:[#allocation8 + $0x60] sm:$0xff]   ;;  %p1083_p12 = scmp.lt.s32.totalorder %s744_s30, %s744_s30 }
  0x40   :  { %817 = vmatprep.subr.bf16.mxu1 %v937_v5  ;;  %v936_v10 = vld [vmem:[#allocation5 + $0x8] sm:$0xff]   ;;  %v942_v11 = vld [vmem:[#allocation8 + $0x28] sm:$0xff]   ;;  %v944_v13 = vld [vmem:[#allocation8 + $0x20] sm:$0xff]  }
  0x41   :  { %818 = vmatpush3.bf16.msra.mxu1 %v938_v6  ;;  %v945_v14 = vld [vmem:[#allocation8 + $0x58] sm:$0xff]   ;;  %v947_v16 = vld [vmem:[#allocation8 + $0x50] sm:$0xff]   ;;  %v949_v18 = vld [vmem:[#allocation8 + $0x48] sm:$0xff]  }
  0x42   :  { %882 = vmatpush3.bf16.msra.mxu0 %v932_v1  ;;  %819 = vmatprep.subr.bf16.mxu1 %v939_v7  ;;  %v946_v15 = vld [vmem:[#allocation8 + $0x18] sm:$0xff]   ;;  %v948_v17 = vld [vmem:[#allocation8 + $0x10] sm:$0xff]   ;;  %v950_v19 = vld [vmem:[#allocation8 + $0x8] sm:$0xff]  }
  0x43   :  { %883 = vmatprep.subr.bf16.mxu0 %v933_v2  ;;  %v951_v20 = vld [vmem:[#allocation8 + $0x40] sm:$0xff]   ;;  %v765_v38 = vld [vmem:[%s1218_s4] ss:$0 sm:$0xff]  ;;  %v954_v51 = vld [vmem:[#allocation8 + $0xf8] sm:$0xff]  }
  0x44   :  { %v952_v21 = vld [vmem:[#allocation8] sm:$0xff]   ;;  %v953_v53 = vld [vmem:[#allocation7] sm:$0xff]   ;;  %v956_v55 = vld [vmem:[#allocation8 + $0xf0] sm:$0xff]  }
  0x45   :  { %820 = vmatpush3.bf16.msra.mxu1 %v940_v8  ;;  %v955_v54 = vld [vmem:[#allocation8 + $0xb8] sm:$0xff]   ;;  %v957_v56 = vld [vmem:[#allocation8 + $0xb0] sm:$0xff]   ;;  %v958_v57 = vld [vmem:[#allocation8 + $0xe8] sm:$0xff]  }
  0x46   :  { %884 = vmatpush3.bf16.msra.mxu0 %v933_v2  ;;  %821 = vmatprep.subr.bf16.mxu1 %v941_v9  ;;  %v959_v58 = vld [vmem:[#allocation8 + $0xa8] sm:$0xff]   ;;  %v960_v59 = vld [vmem:[#allocation8 + $0xe0] sm:$0xff]   ;;  %v962_v61 = vld [vmem:[#allocation8 + $0xd8] sm:$0xff]  }
  0x47   :  { %885 = vmatprep.subr.bf16.mxu0 %v934_v3  ;;  %v961_v60 = vld [vmem:[#allocation8 + $0xa0] sm:$0xff]   ;;  %v963_v62 = vld [vmem:[#allocation8 + $0x98] sm:$0xff]   ;;  %v964_v63 = vld [vmem:[#allocation8 + $0xd0] sm:$0xff]  }
  0x48   :  { %v965_v0 = vld [vmem:[#allocation8 + $0x90] sm:$0xff]   ;;  %v966_v1 = vld [vmem:[#allocation8 + $0xc8] sm:$0xff]   ;;  %v969_v4 = vld [vmem:[#allocation8 + $0x80] sm:$0xff]  }
  0x49   :  { %822 = vmatpush3.bf16.msra.mxu1 %v942_v11  ;;  %v970_v5 = vld [vmem:[#allocation10 + $0x38] sm:$0xff]   ;;  %v971_v6 = vld [vmem:[#allocation10 + $0x30] sm:$0xff]   ;;  %v972_v7 = vld [vmem:[#allocation10 + $0x28] sm:$0xff]  }
  0x4a   :  { %886 = vmatpush3.bf16.msra.mxu0 %v934_v3  ;;  %823 = vmatprep.subr.bf16.mxu1 %v943_v12  ;;  %v968_v3 = vld [vmem:[#allocation8 + $0xc0] sm:$0xff]  }
  0x4b   :  { %891 = vmatprep.subr.bf16.mxu0 %v1113_v28  ;;  %v973_v8 = vld [vmem:[#allocation10 + $0x20] sm:$0xff]  }
  0x4d   :  { %888 = vmatmul.mubr.msk.bf16.vlgmr.msra.gmra.mxu0 %vm142_vm0, %v936_v10  ;;  %824 = vmatpush3.bf16.msra.mxu1 %v944_v13 }
  0x4e   :  { %825 = vmatprep.subr.bf16.mxu1 %v945_v14  ;;  %895 = vmatprep.mubr.msk.bf16.mxu0 %vm1114_vm1, %v1113_v28  ;;  %v974_v14 = vld [vmem:[#allocation10 + $0x18] sm:$0xff]  }
  0x51   :  { %826 = vmatpush3.bf16.msra.mxu1 %v946_v15  ;;  %v975_v15 = vld [vmem:[#allocation10 + $0x10] sm:$0xff]  }
  0x52   :  { %827 = vmatprep.subr.bf16.mxu1 %v947_v16  ;;  %v976_v16 = vld [vmem:[#allocation10 + $0x8] sm:$0xff]  }
  0x55   :  { %828 = vmatpush3.bf16.msra.mxu1 %v948_v17  ;;  %v977_v17 = vld [vmem:[#allocation10] sm:$0xff]  }
  0x56   :  { %829 = vmatprep.subr.bf16.mxu1 %v949_v18 }
  0x59   :  { %830 = vmatpush3.bf16.msra.mxu1 %v950_v19 }
  0x5a   :  { %831 = vmatprep.subr.bf16.mxu1 %v951_v20 }
  0x5d   :  { %832 = vmatpush3.bf16.msra.mxu1 %v952_v21  ;;  %v785_v21 = vld [vmem:[%s1218_s4 + $0x1] ss:$0 sm:$0xff]  ;;  %s1078_s4 = scalar_lea.vmem %s744_s30, 256 }
  0x5e   :  { %899 = vmatprep.subr.bf16.mxu1 %v1113_v28  ;;  %p1079_p11 = scmp.ne.s32.totalorder %s744_s30, %s1078_s4  ;;  %p1084_p13 = scmp.lt.s32.totalorder %s1078_s4, %s1078_s4 }
  0x60   :  { %p1085_p0 = por %p1084_p13, %p1083_p12 }
  0x62   :  { %p1086_p1 = pnand %p1085_p0, %p1079_p11 }
 0x10d   :  { %v889_v22 = vpop.f32.mrf.mxu0 }
 0x10f   :  { %v183_v23 = vpop.f32.mrf.mxu0 }
 0x111   :  { %v890_v24 = vpop.f32.mrf.mxu0 }
 0x112   :  { %v199_v27 = vpack.c.bf16 %v890_v24, %v889_v22 }
 0x113   :  { %v186_v25 = vpop.f32.mrf.mxu0 }
 0x114   :  { %v198_v26 = vpack.c.bf16 %v186_v25, %v183_v23 }
 0x116   :  { %368 = vmatmul.mubr.bf16.vlgmr.msra.gmra.mxu1 %v198_v26 }
 0x117   :  { %375 = vmatprep.mubr.bf16.mxu1 %v933_v2  ;;  %v967_v2 = vld [vmem:[#allocation8 + $0x88] sm:$0xff]   ;;  %900 = vmatpush3.bf16.msra.mxu1 %v970_v5 }
 0x118   :  { %901 = vmatprep.subr.bf16.mxu1 %v1113_v28 }
 0x11b   :  { %902 = vmatpush3.bf16.msra.mxu1 %v971_v6 }
 0x11c   :  { %903 = vmatprep.subr.bf16.mxu1 %v1113_v28 }
 0x11e   :  { %376 = vmatmul.mubr.bf16.gmra.mxu1 %v199_v27 }
 0x11f   :  { %915 = vmatprep.mubr.msk.bf16.mxu1 %vm1114_vm1, %v1113_v28  ;;  %904 = vmatpush3.bf16.msra.mxu1 %v972_v7 }
 0x120   :  { %905 = vmatprep.subr.bf16.mxu1 %v1113_v28 }
 0x123   :  { %906 = vmatpush3.bf16.msra.mxu1 %v973_v8 }
 0x124   :  { %907 = vmatprep.subr.bf16.mxu1 %v1113_v28 }
 0x127   :  { %908 = vmatpush3.bf16.msra.mxu1 %v974_v14 }
 0x128   :  { %909 = vmatprep.subr.bf16.mxu1 %v1113_v28 }
 0x12b   :  { %910 = vmatpush3.bf16.msra.mxu1 %v975_v15 }
 0x12c   :  { %911 = vmatprep.subr.bf16.mxu1 %v1113_v28 }
 0x12f   :  { %912 = vmatpush3.bf16.msra.mxu1 %v976_v16 }
 0x130   :  { %913 = vmatprep.subr.bf16.mxu1 %v1113_v28 }
 0x133   :  { %914 = vmatpush3.bf16.msra.mxu1 %v977_v17 }
 0x1d6   :  { %v833_v29 = vpop.f32.mrf.mxu1 }
 0x1d8   :  { %v834_v30 = vpop.f32.mrf.mxu1 }
 0x1d9   :  { %v835_v40 = vadd.f32 %v834_v30, %v833_v29 }
 0x1da   :  { %v836_v31 = vpop.f32.mrf.mxu1 }
 0x1db   :  { %v370_v45 = vadd.f32 %v835_v40, %v765_v38 }
 0x1dc   :  { %v837_v32 = vpop.f32.mrf.mxu1 }
 0x1dd   :  { %v838_v37 = vadd.f32 %v837_v32, %v836_v31  ;;  %v384_v50 = vmax.f32 %v370_v45, 0.0 }
 0x1de   :  { %v839_v33 = vpop.f32.mrf.mxu1 }
 0x1df   :  { %v373_v43 = vadd.f32 %v838_v37, %v765_v38 }
 0x1e0   :  { %v840_v34 = vpop.f32.mrf.mxu1 }
 0x1e1   :  { %v841_v35 = vadd.f32 %v840_v34, %v839_v33  ;;  %v385_v48 = vmax.f32 %v373_v43, 0.0 }
 0x1e2   :  { %v842_v36 = vpop.f32.mrf.mxu1 }
 0x1e3   :  { %v378_v41 = vadd.f32 %v841_v35, %v765_v38  ;;  %v388_v52 = vpack.c.bf16 %v385_v48, %v384_v50 }
 0x1e4   :  { %v843_v39 = vpop.f32.mrf.mxu1 }
 0x1e5   :  { %v844_v42 = vadd.f32 %v843_v39, %v842_v36  ;;  %v386_v46 = vmax.f32 %v378_v41, 0.0 }
 0x1e7   :  { %v381_v44 = vadd.f32 %v844_v42, %v765_v38 }
 0x1e9   :  { %v387_v47 = vmax.f32 %v381_v44, 0.0 }
 0x1eb   :  { %v389_v49 = vpack.c.bf16 %v387_v47, %v386_v46 }
 0x1ed   :  { %892 = vmatpush3.bf16.msra.mxu0 %v389_v49 }
 0x1ee   :  { %893 = vmatprep.subr.bf16.mxu0 %v1113_v28  ;;  %v802_v28 = vld [vmem:[%s1220_s6] ss:$0 sm:$0xff] }
 0x1f1   :  { %894 = vmatpush3.bf16.msra.mxu0 %v388_v52 }
 0x1f2   :  { %848 = vmatprep.subr.bf16.mxu0 %v954_v51 }
 0x1f4   :  { %896 = vmatmul.mubr.msk.bf16.vlgmr.msra.gmra.mxu0 %vm397_vm2, %v953_v53 }
 0x1f5   :  { %612 = vmatprep.mubr.bf16.mxu0 %v388_v52  ;;  %849 = vmatpush3.bf16.msra.mxu0 %v955_v54 }
 0x1f6   :  { %850 = vmatprep.subr.bf16.mxu0 %v956_v55 }
 0x1f9   :  { %851 = vmatpush3.bf16.msra.mxu0 %v957_v56 }
 0x1fa   :  { %852 = vmatprep.subr.bf16.mxu0 %v958_v57 }
 0x1fd   :  { %853 = vmatpush3.bf16.msra.mxu0 %v959_v58 }
 0x1fe   :  { %854 = vmatprep.subr.bf16.mxu0 %v960_v59 }
 0x201   :  { %855 = vmatpush3.bf16.msra.mxu0 %v961_v60 }
 0x202   :  { %856 = vmatprep.subr.bf16.mxu0 %v962_v61 }
 0x205   :  { %857 = vmatpush3.bf16.msra.mxu0 %v963_v62 }
 0x206   :  { %858 = vmatprep.subr.bf16.mxu0 %v964_v63 }
 0x209   :  { %859 = vmatpush3.bf16.msra.mxu0 %v965_v0 }
 0x20a   :  { %860 = vmatprep.subr.bf16.mxu0 %v966_v1 }
 0x20d   :  { %861 = vmatpush3.bf16.msra.mxu0 %v967_v2 }
 0x20e   :  { %862 = vmatprep.subr.bf16.mxu0 %v968_v3 }
 0x211   :  { %863 = vmatpush3.bf16.msra.mxu0 %v969_v4 }
 0x2b4   :  { %v435_v9 = vpop.f32.mrf.mxu0 }
 0x2b6   :  { %v897_v10 = vpop.f32.mrf.mxu0 }
 0x2b8   :  { %v438_v11 = vpop.f32.mrf.mxu0 }
 0x2b9   :  { %v442_v12 = vpack.c.bf16 %v438_v11, %v435_v9 }
 0x2ba   :  { %v898_v13 = vpop.f32.mrf.mxu0 }
 0x2bb   :  { %613 = vmatmul.mubr.bf16.vlgmr.msra.gmra.mxu0 %v442_v12 }
 0x37b   :  { %v864_v18 = vpop.f32.mrf.mxu0 }
 0x37d   :  { %v865_v19 = vpop.f32.mrf.mxu0 }
 0x37e   :  { %v866_v20 = vadd.f32 %v865_v19, %v864_v18 }
 0x37f   :  { %v867_v22 = vpop.f32.mrf.mxu0 }
 0x380   :  { %v615_v24 = vadd.f32 %v866_v20, %v785_v21 }
 0x381   :  { %v868_v23 = vpop.f32.mrf.mxu0 }
 0x382   :  { %v869_v25 = vadd.f32 %v868_v23, %v867_v22  ;;  %v621_v27 = vmax.f32 %v615_v24, 0.0 }
 0x384   :  { %v618_v26 = vadd.f32 %v869_v25, %v785_v21 }
 0x386   :  { %v622_v29 = vmax.f32 %v618_v26, 0.0 }
 0x388   :  { %v623_v30 = vpack.c.bf16 %v622_v29, %v621_v27 }
 0x38a   :  { %916 = vmatmul.mubr.bf16.vlgmr.msra.gmra.mxu1 %v623_v30 }
 0x44a   :  { %v729_v31 = vpop.f32.mrf.mxu1 }
 0x44b   :  { %v730_v32 = vadd.f32 %v802_v28, %v729_v31 }
 0x44c   :  { %v917_v33 = vpop.f32.mrf.mxu1 }
 0x44d   :  { %736 = vst [vmem:[#allocation11] sm:$0xff] %v730_v32 }
 0x44e   :  { %v732_v34 = vpop.f32.mrf.mxu1 }
 0x44f   :  { %v733_v35 = vadd.f32 %v802_v28, %v732_v34 }
 0x450   :  { %v918_v36 = vpop.f32.mrf.mxu1 }
 0x451   :  { %737 = vst [vmem:[#allocation11 + $0x8] sm:$0xff] %v733_v35 }
 0x452   :  { %1089 = shalt.err (!%p1086_p1)
}
 0x453   :  { %s1116_s8 = smov 128   ;;  %s1117_s6 = smov 8  }
 0x454   :  { %749 = dma.vmem_to_hbm [thread:$0]  %s744_s30, 256, %s1221_s7, [#allocation4], %s1116_s8, %s1116_s8, %s1117_s6  }
 0x455   :  { %1104 = dma.done.wait [#allocation4], 256  }
 0x456   :  { %1105 = vsyncadd [#allocation4], 4294967040 }
 0x457   :  { %753 = vsyncpa [#allocation3], 1 }
 0x458   :  { %754 = vsyncpa [#allocation6], 1 }
 0x459   :  { %755 = vsyncpa [#allocation9], 1 }
 0x45a   :  { %756 = vsyncpa [#allocation4], 1 }

</bundles_post_ra>
